<compile_context>
chip_gen: v6e
topology: v6e:2x2x1
jax: 0.10.0
libtpu: 0.0.40
codegen_flags: <defaults>
</compile_context>

<pallas_src>
import functools
import math

import jax
import jax.numpy as jnp
from jax.experimental import pallas as pl
from jax.experimental.pallas import tpu as pltpu


def _moving_avg_kernel(x_ref, o_ref, xpad_ref, *psum, kernel_size, stride, group):
    """One lane tile: x_ref (L, Fb) -> o_ref (L_out, Fb).

    xpad_ref: (L+2p, Fb) replicate-padded copy (input dtype).
    psum (optional): (L+2p-g+1, Fb) f32 first-level partial sums.
    """
    k = kernel_size
    g = group
    p = (k - 1) // 2
    L, Fb = x_ref.shape
    Lp = L + 2 * p
    L_dense = Lp - k + 1  # stride-1 output length

    # Replicate-pad along the sequence (sublane) axis directly into VMEM
    # scratch via ref stores (no concatenate / relayout copy).  Scratch keeps
    # the input dtype; taps are promoted to f32 at load time.
    xpad_ref[p:p + L, :] = x_ref[...].astype(xpad_ref.dtype)
    if p > 0:
        first = x_ref[0:1, :].astype(xpad_ref.dtype)
        last = x_ref[L - 1:L, :].astype(xpad_ref.dtype)
        xpad_ref[0:p, :] = jnp.broadcast_to(first, (p, Fb))
        xpad_ref[p + L:Lp, :] = jnp.broadcast_to(last, (p, Fb))

    if psum and 1 < g < k:
        # Two-level sliding-window sum: ~2*sqrt(k) VMEM tap loads per output
        # row instead of k (binding vld slot for the Autoformer default k=25).
        psum_ref = psum[0]
        q, r = divmod(k, g)
        M = Lp - g + 1
        # First level: dense g-window partial sums, accumulated in f32.
        ps = xpad_ref[0:M, :].astype(jnp.float32)
        for j in range(1, g):
            ps = ps + xpad_ref[j:j + M, :].astype(jnp.float32)
        psum_ref[...] = ps
        # Second level: q group-strided slices of the partial sums
        # (+ r leftover direct taps when g does not divide k).
        acc = psum_ref[0:L_dense, :]
        for i in range(1, q):
            acc = acc + psum_ref[i * g:i * g + L_dense, :]
        for j in range(q * g, k):
            acc = acc + xpad_ref[j:j + L_dense, :].astype(jnp.float32)
    else:
        # Small kernel: direct k-tap sum (k static shifted slice loads).
        acc = xpad_ref[0:L_dense, :].astype(jnp.float32)
        for j in range(1, k):
            acc = acc + xpad_ref[j:j + L_dense, :].astype(jnp.float32)

    out = acc * (1.0 / k)
    if stride > 1:
        # Apply the stride once on the output side.
        out = out[::stride, :]
    o_ref[...] = out.astype(o_ref.dtype)


def _round_up(n, m):
    return ((n + m - 1) // m) * m


def _vmem_limit_bytes():
    """Generation-aware scoped-VMEM limit: ~3/4 of physical, capped at 96 MiB.

    v7x (64 MiB physical) -> 48 MiB; v5e/v6e (128 MiB) -> 96 MiB.
    Falls back to a conservative 48 MiB if the query is unavailable.
    """
    try:
        cap = int(pltpu.get_tpu_info().vmem_capacity_bytes)
    except Exception:
        cap = 0
    if cap <= 0:
        return 48 * 1024 * 1024
    return min(96 * 1024 * 1024, (cap * 3) // 4)


def _choose_lane_tile(F, per_lane_bytes, budget, prefer_split):
    """Pick the lane-tile width.

    F <= 128: use the full lane extent (block == full dim, allowed by the
    (8,128) rule).  Otherwise use a multiple of 128, as large as the VMEM
    working-set budget allows (up to 8192 lanes), preferring a tile that
    divides F exactly so every output store is an unmasked lane-dense vst.
    """
    if F <= 128:
        return F
    cap = max(128, (budget // max(per_lane_bytes, 1)) // 128 * 128)
    cap = min(cap, 8192, _round_up(F, 128))
    if prefer_split:
        # Guarantee >= 2 lane blocks so the parallel grid axis can shard
        # across both TensorCores (v7x megacore) even when B == 1.
        cap = min(cap, max(128, (_round_up(F, 128) // 2) // 128 * 128))
    best = 0
    c = 128
    while c <= cap:
        if F % c == 0:
            best = c
        c += 128
    if best > 0:
        return best
    # No exact divisor: fall back to a 128-multiple not exceeding F
    # (the last grid block may be partial / masked -- rare case).
    return min(cap, max(128, (F // 128) * 128))


def moving_avg_forward(x, kernel_size, stride=1):
    """x: [B, L, D2, D3] -> [B, L_out, D2, D3] (matches the PyTorch module)."""
    assert x.ndim == 4, x.shape
    B, L, D2, D3 = x.shape
    F = D2 * D3
    k = int(kernel_size)
    s = int(stride)
    p = (k - 1) // 2
    Lp = L + 2 * p
    L_out = (Lp - k) // s + 1
    itemsize = jnp.dtype(x.dtype).itemsize

    # Two-level partial-sum grouping for large kernels.
    if k >= 10:
        g = max(2, math.isqrt(k))
    else:
        g = k  # direct k-tap path
    two_level = 1 < g < k
    q, r = divmod(k, g) if two_level else (0, 0)
    M = Lp - g + 1

    pad_dtype = x.dtype if jnp.issubdtype(x.dtype, jnp.floating) else jnp.float32
    pad_isz = jnp.dtype(pad_dtype).itemsize

    vmem_limit = _vmem_limit_bytes()
    budget = vmem_limit // 2  # per-step working-set target

    # Per-lane VMEM working set: double-buffered in/out blocks + pad scratch
    # (+ first-level partial-sum scratch when two-level is used).
    per_lane = (2 * L + 2 * L_out) * itemsize + Lp * pad_isz
    if two_level:
        per_lane += M * 4

    taps = (g + q + r) if two_level else k
    kern = functools.partial(_moving_avg_kernel, kernel_size=k, stride=s, group=g)

    if F >= 128:
        # --- Natural [B, L, F] layout: no HBM transposes around the kernel. ---
        prefer_split = (B == 1 and F >= 256)
        Fb = _choose_lane_tile(F, per_lane, budget, prefer_split)
        nF = pl.cdiv(F, Fb)
        scratch = [pltpu.VMEM((Lp, Fb), pad_dtype)]
        if two_level:
            scratch.append(pltpu.VMEM((M, Fb), jnp.float32))
        cost = pl.CostEstimate(
            flops=int(taps) * int(L_out) * int(B) * int(F),
            transcendentals=0,
            bytes_accessed=int((L + L_out) * B * F * itemsize),
        )
        out3 = pl.pallas_call(
            kern,
            out_shape=jax.ShapeDtypeStruct((B, L_out, F), x.dtype),
            grid=(B, nF),
            in_specs=[pl.BlockSpec((None, L, Fb), lambda b, i: (b, 0, i))],
            out_specs=pl.BlockSpec((None, L_out, Fb), lambda b, i: (b, 0, i)),
            scratch_shapes=scratch,
            compiler_params=pltpu.CompilerParams(
                dimension_semantics=("parallel", "parallel"),
                vmem_limit_bytes=vmem_limit,
            ),
            cost_estimate=cost,
        )(x.reshape(B, L, F))
        return out3.reshape(B, L_out, D2, D3)

    # --- F < 128: fold batch into the lane axis so stores stay lane-dense. ---
    N = B * F
    x2 = jnp.transpose(x.reshape(B, L, F), (1, 0, 2)).reshape(L, N)
    prefer_split = N >= 256
    Nb = _choose_lane_tile(N, per_lane, budget, prefer_split)
    nN = pl.cdiv(N, Nb)
    scratch = [pltpu.VMEM((Lp, Nb), pad_dtype)]
    if two_level:
        scratch.append(pltpu.VMEM((M, Nb), jnp.float32))
    cost = pl.CostEstimate(
        flops=int(taps) * int(L_out) * int(N),
        transcendentals=0,
        # Includes the wrapper transpose traffic on this fallback path.
        bytes_accessed=int(3 * (L + L_out) * N * itemsize),
    )
    out2 = pl.pallas_call(
        kern,
        out_shape=jax.ShapeDtypeStruct((L_out, N), x.dtype),
        grid=(nN,),
        in_specs=[pl.BlockSpec((L, Nb), lambda i: (0, i))],
        out_specs=pl.BlockSpec((L_out, Nb), lambda i: (0, i)),
        scratch_shapes=scratch,
        compiler_params=pltpu.CompilerParams(
            dimension_semantics=("parallel",),
            vmem_limit_bytes=vmem_limit,
        ),
        cost_estimate=cost,
    )(x2)
    return jnp.transpose(out2.reshape(L_out, B, F), (1, 0, 2)).reshape(
        B, L_out, D2, D3
    )


def _reference(x, kernel_size, stride):
    # Pure-JAX reference mirroring the PyTorch forward exactly.
    p = (kernel_size - 1) // 2
    front = jnp.repeat(x[:, 0:1, ...], p, axis=1)
    end = jnp.repeat(x[:, -1:, ...], p, axis=1)
    xp = jnp.concatenate([front, x, end], axis=1)
    L_pad = xp.shape[1]
    L_out = (L_pad - kernel_size) // stride + 1
    cols = [
        jnp.mean(
            xp[:, t * stride : t * stride + kernel_size, ...].astype(jnp.float32),
            axis=1,
        )
        for t in range(L_out)
    ]
    return jnp.stack(cols, axis=1).astype(x.dtype)


if __name__ == "__main__":
    # Module config (no learned parameters in moving_avg).
    kernel_size = 5
    stride = 1

    # Small input: [B=2, L=16, D2=4, D3=8] -> exercises the folded (F<128),
    # direct-tap path.
    key = jax.random.PRNGKey(0)
    x = jax.random.normal(key, (2, 16, 4, 8), dtype=jnp.float32)

    out = jax.block_until_ready(moving_avg_forward(x, kernel_size, stride))
    ref = _reference(x, kernel_size, stride)
    assert out.shape == ref.shape, (out.shape, ref.shape)
    assert jnp.allclose(out, ref, atol=1e-5, rtol=1e-5), "mismatch vs reference"

    # Autoformer default kernel_size=25 on a lane-dense shape (F = 512):
    # exercises the natural-layout (no-transpose) path with two-level sums.
    key2 = jax.random.PRNGKey(1)
    x_big = jax.random.normal(key2, (4, 32, 8, 64), dtype=jnp.float32)
    out_big = jax.block_until_ready(moving_avg_forward(x_big, 25, 1))
    ref_big = _reference(x_big, 25, 1)
    assert out_big.shape == ref_big.shape, (out_big.shape, ref_big.shape)
    assert jnp.allclose(out_big, ref_big, atol=1e-5, rtol=1e-5), "mismatch (natural path)"

    print("KERNEL_OK")
</pallas_src>

<mosaic_0001>
module attributes {stable_mosaic.version = 11 : i64} {
  func.func @_moving_avg_kernel(%arg0: i32, %arg1: memref<16x64xf32, #tpu.memory_space<vmem>>, %arg2: memref<16x64xf32, #tpu.memory_space<vmem>>, %arg3: memref<20x64xf32, #tpu.memory_space<vmem>>) attributes {dimension_semantics = [#tpu.dimension_semantics<parallel>], iteration_bounds = array<i64: 1>, scalar_prefetch = 0 : i64, scratch_operands = 1 : i64, tpu.core_type = #tpu.core_type<tc>, window_params = [{transform_indices = @transform_0, window_bounds = array<i64: 16, 64>}, {transform_indices = @transform_1, window_bounds = array<i64: 16, 64>}]} {
    %c0 = arith.constant 0 : index
    %c0_0 = arith.constant 0 : index
    %0 = vector.load %arg1[%c0, %c0_0] : memref<16x64xf32, #tpu.memory_space<vmem>>, vector<16x64xf32>
    %c2 = arith.constant 2 : index
    %c0_1 = arith.constant 0 : index
    %1 = vector.load %arg3[%c2, %c0_1] : memref<20x64xf32, #tpu.memory_space<vmem>>, vector<16x64xf32>
    tpu.vector_store %arg3[%c2, %c0_1], %0 {strides = array<i32>} : memref<20x64xf32, #tpu.memory_space<vmem>>, vector<16x64xf32>,
    %c0_2 = arith.constant 0 : index
    %c0_3 = arith.constant 0 : index
    %2 = vector.load %arg1[%c0_2, %c0_3] : memref<16x64xf32, #tpu.memory_space<vmem>>, vector<1x64xf32>
    %c15 = arith.constant 15 : index
    %c0_4 = arith.constant 0 : index
    %3 = vector.load %arg1[%c15, %c0_4] : memref<16x64xf32, #tpu.memory_space<vmem>>, vector<1x64xf32>
    %4 = vector.shape_cast %2 : vector<1x64xf32> to vector<1x64xf32>
    %5 = vector.broadcast %4 : vector<1x64xf32> to vector<2x64xf32>
    %c0_5 = arith.constant 0 : index
    %c0_6 = arith.constant 0 : index
    %6 = vector.load %arg3[%c0_5, %c0_6] : memref<20x64xf32, #tpu.memory_space<vmem>>, vector<2x64xf32>
    tpu.vector_store %arg3[%c0_5, %c0_6], %5 {strides = array<i32>} : memref<20x64xf32, #tpu.memory_space<vmem>>, vector<2x64xf32>,
    %7 = vector.shape_cast %3 : vector<1x64xf32> to vector<1x64xf32>
    %8 = vector.broadcast %7 : vector<1x64xf32> to vector<2x64xf32>
    %c18 = arith.constant 18 : index
    %c0_7 = arith.constant 0 : index
    %9 = vector.load %arg3[%c18, %c0_7] : memref<20x64xf32, #tpu.memory_space<vmem>>, vector<2x64xf32>
    tpu.vector_store %arg3[%c18, %c0_7], %8 {strides = array<i32>} : memref<20x64xf32, #tpu.memory_space<vmem>>, vector<2x64xf32>,
    %c0_8 = arith.constant 0 : index
    %c0_9 = arith.constant 0 : index
    %10 = vector.load %arg3[%c0_8, %c0_9] : memref<20x64xf32, #tpu.memory_space<vmem>>, vector<16x64xf32>
    %c1 = arith.constant 1 : index
    %c0_10 = arith.constant 0 : index
    %11 = vector.load %arg3[%c1, %c0_10] : memref<20x64xf32, #tpu.memory_space<vmem>>, vector<16x64xf32>
    %12 = arith.addf %10, %11 : vector<16x64xf32>
    %c2_11 = arith.constant 2 : index
    %c0_12 = arith.constant 0 : index
    %13 = vector.load %arg3[%c2_11, %c0_12] : memref<20x64xf32, #tpu.memory_space<vmem>>, vector<16x64xf32>
    %14 = arith.addf %12, %13 : vector<16x64xf32>
    %c3 = arith.constant 3 : index
    %c0_13 = arith.constant 0 : index
    %15 = vector.load %arg3[%c3, %c0_13] : memref<20x64xf32, #tpu.memory_space<vmem>>, vector<16x64xf32>
    %16 = arith.addf %14, %15 : vector<16x64xf32>
    %c4 = arith.constant 4 : index
    %c0_14 = arith.constant 0 : index
    %17 = vector.load %arg3[%c4, %c0_14] : memref<20x64xf32, #tpu.memory_space<vmem>>, vector<16x64xf32>
    %18 = arith.addf %16, %17 : vector<16x64xf32>
    %cst = arith.constant 2.000000e-01 : f32
    %19 = vector.broadcast %cst : f32 to vector<16x64xf32>
    %20 = arith.mulf %18, %19 : vector<16x64xf32>
    %c0_15 = arith.constant 0 : index
    %c0_16 = arith.constant 0 : index
    %21 = vector.load %arg2[%c0_15, %c0_16] : memref<16x64xf32, #tpu.memory_space<vmem>>, vector<16x64xf32>
    tpu.vector_store %arg2[%c0_15, %c0_16], %20 {strides = array<i32>} : memref<16x64xf32, #tpu.memory_space<vmem>>, vector<16x64xf32>,
    return
  }
  func.func @transform_0(%arg0: i32) -> (i32, i32) {
    %c0_i32 = arith.constant 0 : i32
    %c0_i32_0 = arith.constant 0 : i32
    return %c0_i32, %arg0 : i32, i32
  }
  func.func @transform_1(%arg0: i32) -> (i32, i32) {
    %c0_i32 = arith.constant 0 : i32
    %c0_i32_0 = arith.constant 0 : i32
    return %c0_i32, %arg0 : i32, i32
  }
}

</mosaic_0001>

<bundles_post_ra>
// kernel: tpu_custom_call.1
= control target key start
LH: loop header
LB: loop body
LE: loop exit
PB: predicated region body
PF: predicated region fallthrough
CT: control target
= control target key end

     0   :  { %6 = vsyncpa [#allocation4], 0  ;;  %s160_s0 = inlined_call_operand.hbm [shape: f32[16,64], index: 0, kind: input, shape index: {}]   ;;  %s161_s1 = inlined_call_operand.hbm [shape: f32[16,64], index: 1, kind: output, shape index: {}]  }
   0x1   :  { %7 = vsyncpa [#allocation5], 0  ;;  %s130_s6 = smov [#allocation3]  }
   0x2   :  { %s13_s7 = sshll.u32 %s130_s6, 4  ;;  %s14_s7 = int_to_ptr.vmem [resolvable:$true] %s13_s7 }
   0x3   :  { %s94_s8 = scalar_lea.vmem %s14_s7, 256  ;;  %p99_p1 = scmp.lt.s32.totalorder %s14_s7, %s14_s7 }
   0x4   :  { %p95_p0 = scmp.ne.s32.totalorder %s14_s7, %s94_s8  ;;  %p100_p2 = scmp.lt.s32.totalorder %s94_s8, %s94_s8 }
   0x6   :  { %p101_p3 = por %p100_p2, %p99_p1 }
   0x8   :  { %p102_p4 = pnand %p101_p3, %p95_p0 }
   0xa   :  { %105 = shalt.err (!%p102_p4)
}
   0xb   :  { %s131_s9 = smov 128   ;;  %s132_s10 = smov 8  }
   0xc   :  { %19 = dma.hbm_to_vmem [thread:$0]  %s160_s0, 256, %s14_s7, [#allocation4], %s131_s9, %s131_s9, %s132_s10  }
   0xd   :  { %126 = dma.done.wait [#allocation4], 256  }
   0xe   :  { %127 = vsyncadd [#allocation4], 4294967040  ;;  %vm25_vm0 = vcmask 523264   ;;  %vm34_vm1 = vcmask 517120   ;;  %v23_v0 = vld [vmem:[#allocation3] sm:$0xff]  ;;  %v24_v1 = vld [vmem:[#allocation3 + $0x8] sm:$0xff] }
   0xf   :  { %v80_v2 = vld [vmem:[#allocation3] ss:$0 sm:$0xff]  ;;  %26 = vst.msk [vmem:[#allocation2 + $0x2] sm:$0xff] %vm25_vm0, %v23_v0  ;;  %27 = vst.msk [vmem:[#allocation2 + $0xa] sm:$0xff] %vm25_vm0, %v24_v1  ;;  %v81_v3 = vld [vmem:[#allocation3 + $0xf] ss:$0 sm:$0xff] }
  0x10   :  { %35 = vst.msk [vmem:[#allocation2] sm:$0x3] %vm34_vm1, %v80_v2  ;;  %40 = vst.msk [vmem:[#allocation2 + $0x12] sm:$0x3] %vm34_vm1, %v81_v3  ;;  %s133_s0 = smov [#allocation6]  }
  0x11   :  { %s68_s13 = sshll.u32 %s133_s0, 4  ;;  %s69_s13 = int_to_ptr.vmem [resolvable:$true] %s68_s13 }
  0x12   :  { %s106_s14 = scalar_lea.vmem %s69_s13, 256  ;;  %p111_p6 = scmp.lt.s32.totalorder %s69_s13, %s69_s13 }
  0x13   :  { %p107_p5 = scmp.ne.s32.totalorder %s69_s13, %s106_s14  ;;  %p112_p7 = scmp.lt.s32.totalorder %s106_s14, %s106_s14 }
  0x15   :  { %p113_p8 = por %p112_p7, %p111_p6 }
  0x16   :  { %v42_v7 = vld [vmem:[#allocation2 + $0x8] sm:$0xff] }
  0x17   :  { %v41_v4 = vld [vmem:[#allocation2] sm:$0xff]  ;;  %v44_v9 = vld [vmem:[#allocation2 + $0x9] sm:$0xff]  ;;  %p114_p9 = pnand %p113_p8, %p107_p5 }
  0x18   :  { %v43_v5 = vld [vmem:[#allocation2 + $0x1] sm:$0xff]  ;;  %v46_v11 = vadd.f32 %v44_v9, %v42_v7  ;;  %v48_v13 = vld [vmem:[#allocation2 + $0xa] sm:$0xff] }
  0x19   :  { %v45_v6 = vadd.f32 %v43_v5, %v41_v4  ;;  %v47_v8 = vld [vmem:[#allocation2 + $0x2] sm:$0xff]  ;;  %v52_v17 = vld [vmem:[#allocation2 + $0xb] sm:$0xff] }
  0x1a   :  { %v51_v12 = vld [vmem:[#allocation2 + $0x3] sm:$0xff]  ;;  %v50_v15 = vadd.f32 %v48_v13, %v46_v11  ;;  %v56_v20 = vld [vmem:[#allocation2 + $0xc] sm:$0xff] }
  0x1b   :  { %v49_v10 = vadd.f32 %v47_v8, %v45_v6  ;;  %v55_v16 = vld [vmem:[#allocation2 + $0x4] sm:$0xff] }
  0x1c   :  { %v54_v19 = vadd.f32 %v52_v17, %v50_v15 }
  0x1d   :  { %v53_v14 = vadd.f32 %v51_v12, %v49_v10 }
  0x1e   :  { %v58_v22 = vadd.f32 %v56_v20, %v54_v19 }
  0x1f   :  { %v57_v18 = vadd.f32 %v55_v16, %v53_v14 }
  0x20   :  { %v60_v23 = vmul.f32 0.2, %v58_v22 }
  0x21   :  { %v59_v21 = vmul.f32 0.2, %v57_v18 }
  0x22   :  { %62 = vst.msk [vmem:[#allocation6 + $0x8] sm:$0xff] %vm25_vm0, %v60_v23 }
  0x23   :  { %61 = vst.msk [vmem:[#allocation6] sm:$0xff] %vm25_vm0, %v59_v21 }
  0x24   :  { %117 = shalt.err (!%p114_p9)
}
  0x25   :  { %74 = dma.vmem_to_hbm [thread:$0]  %s69_s13, 256, %s161_s1, [#allocation5], %s131_s9, %s131_s9, %s132_s10  }
  0x26   :  { %128 = dma.done.wait [#allocation5], 256  }
  0x27   :  { %129 = vsyncadd [#allocation5], 4294967040 }
  0x28   :  { %78 = vsyncpa [#allocation4], 1 }
  0x29   :  { %79 = vsyncpa [#allocation5], 1 }

</bundles_post_ra>
